<compile_context>
chip_gen: v5e
topology: v5e:2x2
jax: 0.10.0
libtpu: 0.0.40
codegen_flags: <defaults>
</compile_context>

<pallas_src>
import functools
import math

import jax
import jax.numpy as jnp
from jax.experimental import pallas as pl
from jax.experimental.pallas import tpu as pltpu


# ------------------------------ fused kernel --------------------------------

def fused_attention_kernel(x_ref, w_ref, b_ref, o_ref, *, H, Dh, E):
    # x_ref: (1, L, Cin)   w_ref: (Cin, 2E+O)   b_ref: (1, 2E+O)
    # o_ref: (1, L, H*Dh)  (lane-dense output slab, last dim = H*Dh)
    x = x_ref[0]                                                  # [L, Cin]
    L = x.shape[0]

    # Fused Q/K/V projection (one MXU matmul).  The 1/sqrt(head_dim) scale is
    # already folded into the Q columns of w/b, so no extra multiply is needed.
    qkv = jnp.dot(x, w_ref[...], preferred_element_type=jnp.float32)
    qkv = qkv + b_ref[...]                                        # [L, 2E+O]

    q = qkv[:, :E].reshape(L, H, Dh)
    k = qkv[:, E:2 * E].reshape(L, H, Dh)
    v = qkv[:, 2 * E:].reshape(L, H, Dh)

    # Per-position head-vs-head scores: PyTorch `q @ k.transpose(2, 3)` on
    # [B, L, H, Dh] tensors  ->  [L, H, H] here (already scaled via the weight).
    qk = jnp.einsum('lhd,ljd->lhj', q, k,
                    preferred_element_type=jnp.float32)           # [L, H, H]

    # PyTorch `.view(B, H, L, L)`: flat reinterpretation (identity when H == L).
    scores = qk.reshape(H, L, L)

    # Softmax over the last axis, kept in f32; the divide goes through the EUP
    # reciprocal path instead of the VALU divide path.
    m = jnp.max(scores, axis=-1, keepdims=True)
    e = jnp.exp(scores - m)
    s = jnp.sum(e, axis=-1, keepdims=True)
    attn = e * pl.reciprocal(s, approx=False)                     # [H, L, L]

    # Relayout v [L, H, Dh] -> [H, L, Dh] inside VMEM (no XLA-level transpose,
    # no extra HBM traffic), then a canonical batched matmul on the MXU.
    vt = pltpu.einshape('lhd->hld', v)                            # [H, L, Dh]
    out = jnp.einsum('hij,hjd->hid', attn, vt,
                     preferred_element_type=jnp.float32)          # [H, L, Dh]

    # PyTorch final `.view(B, L, -1)`: flat reinterpretation, written out as a
    # lane-dense [L, H*Dh] slab (last dim 32 instead of 4).
    o_ref[0] = out.reshape(H, L * Dh).astype(o_ref.dtype)


def fused_attention(x, w, b, *, H, Dh, E):
    B, L, Cin = x.shape
    Ctot = w.shape[1]
    kernel = functools.partial(fused_attention_kernel, H=H, Dh=Dh, E=E)
    return pl.pallas_call(
        kernel,
        out_shape=jax.ShapeDtypeStruct((B, L, H * Dh), x.dtype),
        grid_spec=pltpu.PrefetchScalarGridSpec(
            num_scalar_prefetch=0,
            # Keep the batch axis as a parallel grid axis so the two v7x
            # TensorCores can each take one batch element; on v5e/v6e the
            # extra grid step costs only ~0.35 us.
            grid=(B,),
            in_specs=[
                pl.BlockSpec((1, L, Cin), lambda bb: (bb, 0, 0)),
                pl.BlockSpec((Cin, Ctot), lambda bb: (0, 0)),
                pl.BlockSpec((1, Ctot), lambda bb: (0, 0)),
            ],
            out_specs=pl.BlockSpec((1, L, H * Dh), lambda bb: (bb, 0, 0)),
        ),
        compiler_params=pltpu.CompilerParams(dimension_semantics=("parallel",)),
    )(x, w, b)


# --------------------------- module-level wrapper ----------------------------

class AttentionPallas:
    """Mirrors models/attentions.py Attention (positional-encoding branch off)."""

    def __init__(self, in_dim, out_dim, embed_dim=None, num_heads=1, *, key):
        if embed_dim is None:
            embed_dim = in_dim
        assert embed_dim % num_heads == 0
        self.num_heads = num_heads
        self.head_dim = embed_dim // num_heads
        self.embed_dim = embed_dim
        self.out_dim = out_dim

        # Deterministic init, PyTorch-Conv1d-like uniform(-1/sqrt(fan_in), +).
        bound = 1.0 / math.sqrt(in_dim)
        ks = jax.random.split(key, 6)

        def u(k, shape):
            return jax.random.uniform(k, shape, jnp.float32, -bound, bound)

        # PyTorch Conv1d weight is [out, in, 1]; stored here as [out, in].
        self.wq = u(ks[0], (embed_dim, in_dim))
        self.bq = u(ks[1], (embed_dim,))
        self.wk = u(ks[2], (embed_dim, in_dim))
        self.bk = u(ks[3], (embed_dim,))
        self.wv = u(ks[4], (out_dim, in_dim))
        self.bv = u(ks[5], (out_dim,))

        # Precompute the fused projection weight/bias once (no per-call XLA
        # concatenate / transpose) and fold the softmax 1/sqrt(head_dim) scale
        # into the Q columns.
        scale = 1.0 / math.sqrt(self.head_dim)
        self.w_fused = jnp.concatenate(
            [self.wq.T * scale, self.wk.T, self.wv.T], axis=1)       # [Cin, 2E+O]
        self.b_fused = jnp.concatenate(
            [self.bq * scale, self.bk, self.bv])[None, :]            # [1, 2E+O]

        # TODO(synk): the positional-encoding branch of the reference module is
        # not implemented (its make(...) factory is unavailable); only the
        # default forward path (pos off) is covered.

    def __call__(self, x):
        B, L, Cin = x.shape
        H, Dh = self.num_heads, self.head_dim
        assert H == L, "reference .view() reinterpret requires num_heads == seq_length"
        assert self.out_dim == H * Dh, "reference .view() requires out_dim == embed_dim"
        return fused_attention(x, self.w_fused, self.b_fused,
                               H=H, Dh=Dh, E=self.embed_dim)


# ------------------------------- pure-JAX ref --------------------------------

def reference(x, mod):
    B, L, _ = x.shape
    H, Dh = mod.num_heads, mod.head_dim
    q = jnp.einsum('blc,ec->ble', x, mod.wq) + mod.bq
    k = jnp.einsum('blc,ec->ble', x, mod.wk) + mod.bk
    v = jnp.einsum('blc,oc->blo', x, mod.wv) + mod.bv
    q4 = q.reshape(B, L, H, Dh)
    k4 = k.reshape(B, L, H, Dh)
    v4 = v.reshape(B, L, H, Dh)
    qk = jnp.einsum('blhd,bljd->blhj', q4, k4) / math.sqrt(Dh)
    qk = qk.reshape(B, H, L, L)
    attn = jax.nn.softmax(qk, axis=-1)
    vt = jnp.transpose(v4, (0, 2, 1, 3))
    out = jnp.einsum('bhij,bhjd->bhid', attn, vt)
    return out.reshape(B, L, H * Dh)


if __name__ == "__main__":
    key = jax.random.PRNGKey(0)
    k_x, k_p = jax.random.split(key)

    B, L, in_dim = 2, 8, 32
    embed_dim, out_dim, num_heads = 32, 32, 8   # num_heads == seq_length (see note)

    x = jax.random.normal(k_x, (B, L, in_dim), jnp.float32)
    mod = AttentionPallas(in_dim, out_dim, embed_dim, num_heads, key=k_p)

    y = mod(x)
    y = jax.block_until_ready(y)

    y_ref = reference(x, mod)
    assert y.shape == (B, L, out_dim)
    err = float(jnp.max(jnp.abs(y - y_ref)))
    assert jnp.allclose(y, y_ref, atol=1e-4, rtol=1e-4), err
    print("KERNEL_OK")
</pallas_src>

<mosaic_0001>
module attributes {stable_mosaic.version = 11 : i64} {
  func.func @fused_attention_kernel(%arg0: i32, %arg1: memref<1x8x32xf32, #tpu.memory_space<vmem>>, %arg2: memref<32x96xf32, #tpu.memory_space<vmem>>, %arg3: memref<1x96xf32, #tpu.memory_space<vmem>>, %arg4: memref<1x8x32xf32, #tpu.memory_space<vmem>>) attributes {dimension_semantics = [#tpu.dimension_semantics<parallel>], iteration_bounds = array<i64: 2>, scalar_prefetch = 0 : i64, scratch_operands = 0 : i64, tpu.core_type = #tpu.core_type<tc>, window_params = [{transform_indices = @transform_0, window_bounds = array<i64: 1, 8, 32>}, {pipeline_mode = #tpu.pipeline_mode<synchronous>, transform_indices = @transform_1, window_bounds = array<i64: 32, 96>}, {pipeline_mode = #tpu.pipeline_mode<synchronous>, transform_indices = @transform_2, window_bounds = array<i64: 1, 96>}, {transform_indices = @transform_3, window_bounds = array<i64: 1, 8, 32>}]} {
    %c0 = arith.constant 0 : index
    %c0_0 = arith.constant 0 : index
    %c0_1 = arith.constant 0 : index
    %0 = vector.load %arg1[%c0, %c0_0, %c0_1] : memref<1x8x32xf32, #tpu.memory_space<vmem>>, vector<1x8x32xf32>
    %1 = vector.shape_cast %0 : vector<1x8x32xf32> to vector<8x32xf32>
    %c0_2 = arith.constant 0 : index
    %c0_3 = arith.constant 0 : index
    %2 = vector.load %arg2[%c0_2, %c0_3] : memref<32x96xf32, #tpu.memory_space<vmem>>, vector<32x96xf32>
    %cst = arith.constant dense<0.000000e+00> : vector<8x96xf32>
    %3 = tpu.matmul %1, %2, %cst {dimension_numbers = #tpu.dot_dimension_numbers<[1], [0], [0], [1], [0, 0, 1, 1], [], []>} : vector<8x32xf32>, vector<32x96xf32>, vector<8x96xf32> -> vector<8x96xf32>
    %c0_4 = arith.constant 0 : index
    %c0_5 = arith.constant 0 : index
    %4 = vector.load %arg3[%c0_4, %c0_5] : memref<1x96xf32, #tpu.memory_space<vmem>>, vector<1x96xf32>
    %5 = vector.broadcast %4 : vector<1x96xf32> to vector<8x96xf32>
    %6 = arith.addf %3, %5 : vector<8x96xf32>
    %7 = vector.extract_strided_slice %6 {offsets = [0, 0], sizes = [8, 32], strides = [1, 1]} : vector<8x96xf32> to vector<8x32xf32>
    %8 = vector.shape_cast %7 : vector<8x32xf32> to vector<8x8x4xf32>
    %9 = vector.extract_strided_slice %6 {offsets = [0, 32], sizes = [8, 32], strides = [1, 1]} : vector<8x96xf32> to vector<8x32xf32>
    %10 = vector.shape_cast %9 : vector<8x32xf32> to vector<8x8x4xf32>
    %11 = vector.extract_strided_slice %6 {offsets = [0, 64], sizes = [8, 32], strides = [1, 1]} : vector<8x96xf32> to vector<8x32xf32>
    %12 = vector.shape_cast %11 : vector<8x32xf32> to vector<8x8x4xf32>
    "tpu.trace_start"() <{level = 10 : i32, message = "lhd,ljd->lhj"}> : () -> ()
    %cst_6 = arith.constant dense<0.000000e+00> : vector<8x8x8xf32>
    %13 = tpu.matmul %8, %10, %cst_6 {dimension_numbers = #tpu.dot_dimension_numbers<[2], [2], [1], [1], [0, 0, 0, 1, 1, 1], [0], [0]>} : vector<8x8x4xf32>, vector<8x8x4xf32>, vector<8x8x8xf32> -> vector<8x8x8xf32>
    "tpu.trace_stop"() : () -> ()
    %cst_7 = arith.constant dense<0xFF800000> : vector<8x8xf32>
    %14 = vector.multi_reduction <maximumf>, %13, %cst_7 [2] : vector<8x8x8xf32> to vector<8x8xf32>
    %15 = vector.shape_cast %14 : vector<8x8xf32> to vector<8x8x1xf32>
    %16 = vector.broadcast %15 : vector<8x8x1xf32> to vector<8x8x8xf32>
    %17 = arith.subf %13, %16 : vector<8x8x8xf32>
    %18 = math.exp %17 : vector<8x8x8xf32>
    %cst_8 = arith.constant dense<0.000000e+00> : vector<8x8xf32>
    %19 = vector.multi_reduction <add>, %18, %cst_8 [2] : vector<8x8x8xf32> to vector<8x8xf32>
    %20 = vector.shape_cast %19 : vector<8x8xf32> to vector<8x8x1xf32>
    %21 = tpu.reciprocal %20 : vector<8x8x1xf32> -> vector<8x8x1xf32>
    %22 = vector.broadcast %21 : vector<8x8x1xf32> to vector<8x8x8xf32>
    %23 = arith.mulf %18, %22 : vector<8x8x8xf32>
    %24 = tpu.transpose %12, [1, 0, 2] : vector<8x8x4xf32> -> vector<8x8x4xf32>
    "tpu.trace_start"() <{level = 10 : i32, message = "hij,hjd->hid"}> : () -> ()
    %cst_9 = arith.constant dense<0.000000e+00> : vector<8x8x4xf32>
    %25 = tpu.matmul %23, %24, %cst_9 {dimension_numbers = #tpu.dot_dimension_numbers<[2], [1], [1], [2], [0, 0, 0, 1, 1, 2], [0], [0]>} : vector<8x8x8xf32>, vector<8x8x4xf32>, vector<8x8x4xf32> -> vector<8x8x4xf32>
    "tpu.trace_stop"() : () -> ()
    %26 = vector.shape_cast %25 : vector<8x8x4xf32> to vector<8x32xf32>
    %c0_10 = arith.constant 0 : index
    %c0_11 = arith.constant 0 : index
    %c0_12 = arith.constant 0 : index
    %27 = vector.load %arg4[%c0_10, %c0_11, %c0_12] : memref<1x8x32xf32, #tpu.memory_space<vmem>>, vector<1x8x32xf32>
    %28 = vector.shape_cast %27 : vector<1x8x32xf32> to vector<8x32xf32>
    %29 = vector.shape_cast %26 : vector<8x32xf32> to vector<1x8x32xf32>
    tpu.vector_store %arg4[%c0_10, %c0_11, %c0_12], %29 {strides = array<i32>} : memref<1x8x32xf32, #tpu.memory_space<vmem>>, vector<1x8x32xf32>,
    return
  }
  func.func @transform_0(%arg0: i32) -> (i32, i32, i32) {
    %c0_i32 = arith.constant 0 : i32
    %c0_i32_0 = arith.constant 0 : i32
    %c0_i32_1 = arith.constant 0 : i32
    return %arg0, %c0_i32, %c0_i32_0 : i32, i32, i32
  }
  func.func @transform_1(%arg0: i32) -> (i32, i32) {
    %c0_i32 = arith.constant 0 : i32
    %c0_i32_0 = arith.constant 0 : i32
    %c0_i32_1 = arith.constant 0 : i32
    return %c0_i32, %c0_i32_0 : i32, i32
  }
  func.func @transform_2(%arg0: i32) -> (i32, i32) {
    %c0_i32 = arith.constant 0 : i32
    %c0_i32_0 = arith.constant 0 : i32
    %c0_i32_1 = arith.constant 0 : i32
    return %c0_i32, %c0_i32_0 : i32, i32
  }
  func.func @transform_3(%arg0: i32) -> (i32, i32, i32) {
    %c0_i32 = arith.constant 0 : i32
    %c0_i32_0 = arith.constant 0 : i32
    %c0_i32_1 = arith.constant 0 : i32
    return %arg0, %c0_i32, %c0_i32_0 : i32, i32, i32
  }
}

</mosaic_0001>

<bundles_post_ra>
// kernel: tpu_custom_call.1
= control target key start
LH: loop header
LB: loop body
LE: loop exit
PB: predicated region body
PF: predicated region fallthrough
CT: control target
= control target key end

     0   :  { %8 = vsyncpa [#allocation3], 0  ;;  %s2498_s0 = inlined_call_operand.hbm [shape: f32[2,8,32], index: 0, kind: input, shape index: {}]   ;;  %s2499_s1 = inlined_call_operand.hbm [shape: f32[32,96], index: 1, kind: input, shape index: {}]   ;;  %s2500_s2 = inlined_call_operand.vmem [shape: f32[1,96], index: 2, kind: input, shape index: {}]   ;;  %s2501_s3 = inlined_call_operand.hbm [shape: f32[2,8,32], index: 3, kind: output, shape index: {}]  }
   0x1   :  { %10 = vsyncpa [#allocation3 + $0x1], 0 }
   0x2   :  { %11 = vsyncpa [#allocation6], 0 }
   0x3   :  { %12 = vsyncpa [#allocation4], 0 }
   0x4   :  { %14 = vsyncpa [#allocation4 + $0x1], 0  ;;  %s1934_s12 = smov 0   ;;  %s1936_s13 = smov 0  }
   0x5   :  { %s1938_s14 = smov 0   ;;  %s1940_s15 = smov 0  }
   0x6 LB: > { %s130_s18 = sshll.u32 %s2499_s1, 4  ;;  %s1958_s19 = sadd.s32 4294967295, %s1891_s15   ;;  %s1891_s15 = sphi %s1940_s15, %s2517_s15   ;;  %s1887_s14 = sphi %s1938_s14, %s2516_s14   ;;  %s1883_s13 = sphi %s1936_s13, %s2515_s13   ;;  %s1879_s12 = sphi %s1934_s12, %s2514_s12   ;;  %s131_s18 = int_to_ptr.hbm [resolvable:$true] %s130_s18 }
   0x7   : > { %p1593_p0 = scmp.ge.s32.totalorder %s1891_s15, 1  ;;  %p41_p1 = scmp.eq.s32.totalorder %s1958_s19, 0 }
   0x8   : > { %p119_p2 = scmp.lt.s32.totalorder %s1891_s15, 3  ;;  %s1893_s21 = smov [#allocation5]  }
   0x9   : > { %s132_s22 = sshll.u32 %s1893_s21, 4  ;;  %s1894_s23 = smov 128   ;;  %s133_s22 = int_to_ptr.vmem [resolvable:$true] %s132_s22 }
   0xa   : > { %p1963_p3 = pnand %p1593_p0, %p119_p2  ;;  %s1895_s24 = smov 8  }
   0xb   : > { %s1592_s25 = sadd.s32 4294967294, %s1891_s15   ;;  %s1974_s26 = sadd.s32 1, %s1891_s15  }
   0xc   : > { %p1639_p4 = pneg %p1963_p3  ;;  %s27_s27 = sadd.s32 1, %s1887_s14 }
   0xd   : > { %s24_s28 = ssub.s32 %s1891_s15, %s1974_s26  ;;  %p34_p7 = scmp.ne.s32.totalorder %s1887_s14, %s1883_s13 }
   0xe   : > { %p1640_p6 = pnand %p1639_p4, %p41_p1  ;;  %p25_p8 = scmp.eq.s32.totalorder %s24_s28, 0 }
   0xf   : > { %p35_p9 = scmp.eq.s32.totalorder %s1891_s15, 0  ;;  %p40_p10 = scmp.ne.s32.totalorder %s1883_s13, %s1879_s12 }
  0x10   : > { %1642 = dma.hbm_to_vmem [thread:$0]  (!%p1640_p6), %s131_s18, 512, %s133_s22, [#allocation6], %s1894_s23, %s1894_s23, %s1895_s24  }
  0x11   : > { %p106_p11 = scmp.eq.s32.totalorder %s1958_s19, 1  ;;  %p1990_p12 = por %p41_p1, %p40_p10 }
  0x12   : > { %s1986_s29 = scalar_select %p25_p8, %s1887_s14, %s27_s27  }
  0x13   : > { %p1994_p13 = por %p106_p11, %p34_p7  ;;  %p112_p0 = scmp.eq.s32.totalorder %s1592_s25, 1 }
  0x14   : > { %p36_p2 = por %p35_p9, %p34_p7  ;;  %s149_s5 = sand.u32 1, %s1887_s14  }
  0x15   : > { %p1999_p4 = por %p112_p0, %p40_p10  ;;  %p1652_p6 = scmp.lt.s32.totalorder %s1891_s15, 2 }
  0x16   : > { %s1596_s7 = sshll.u32 %s149_s5, 3  ;;  %s1597_s8 = sshll.u32 %s1891_s15, 3 }
  0x17   : > { %s157_s11 = scalar_lea.hbm %s2498_s0, %s1597_s8  ;;  %s153_s17 = scalar_lea.vmem [#allocation2], %s1596_s7 }
  0x18   : > { %s159_s16 = sshll.u32 %s157_s11, 4  ;;  %s161_s18 = sshll.u32 %s153_s17, 4  ;;  %s160_s16 = int_to_ptr.hbm [resolvable:$true] %s159_s16  ;;  %s162_s18 = int_to_ptr.vmem [resolvable:$true] %s161_s18 }
  0x19   : > { %p2008_p8 = pnand %p1652_p6, %p36_p2  ;;  %s150_s22 = scalar_lea.sflag [#allocation3], %s149_s5 }
  0x1a   : > { %s1791_s23 = sshra.s32 %s160_s16, 4  ;;  %s1798_s28 = scalar_lea.hbm %s2498_s0, 16  ;;  %s1792_s23 = int_to_ptr.hbm [resolvable:$true] %s1791_s23 }
  0x1b   : > { %s1793_s24 = scalar_lea.hbm %s1792_s23, 8  ;;  %p1795_p9 = pneg %p2008_p8 }
  0x1c   : > { %p1794_p7 = scmp.ne.s32.totalorder %s1792_s23, %s1793_s24  ;;  %p1799_p0 = scmp.lt.s32.totalorder %s1792_s23, %s2498_s0 }
  0x1d   : > { %p1800_p2 = scmp.lt.s32.totalorder %s1798_s28, %s1793_s24 }
  0x1e   : > { %p1796_p10 = pnand %p1795_p9, %p1794_p7 }
  0x1f   : > { %p1801_p6 = por %p1800_p2, %p1799_p0 }
  0x20   : > { %p1797_p11 = pneg %p1796_p10 }
  0x22   : > { %p1802_p5 = pnand %p1801_p6, %p1797_p11 }
  0x24   : > { %1805 = shalt.err (!%p1802_p5)
}
  0x25   : > { %1646 = dma.hbm_to_vmem [thread:$0]  (!%p2008_p8), %s160_s16, 128, %s162_s18, %s150_s22  }
  0x26   : > { %170 = sbr.rel (%p1963_p3) target bundleno = 1132 (0x46c), region = 32  ;;  %s2025_s5 = sand.u32 (!%p1963_p3), 1, %s1883_s13  }
  0x27   : > { %s1599_s9 = sshll.u32 (!%p1963_p3), %s2025_s5, 3  ;;  %s173_s10 = scalar_lea.sflag (!%p1963_p3), [#allocation3], %s2025_s5 }
  0x28   : > { %s176_s11 = scalar_lea.vmem (!%p1963_p3), [#allocation2], %s1599_s9 }
  0x2b   : > { %1866 = dma.done.wait (%p1990_p12), %s173_s10, 128  }
  0x2c   : > { %1868 = vsyncadd (%p1990_p12), %s173_s10, 4294967168 }
  0x2d   : > { %1870 = dma.done.wait (%p41_p1), [#allocation6], 512  }
  0x2e   : > { %1872 = vsyncadd (%p41_p1), [#allocation6], 4294966784  ;;  %v209_v0 = vld [vmem:[#allocation5 + $0x18] sm:$0xff]  ;;  %v208_v1 = vld [vmem:[#allocation5 + $0x10] sm:$0xff]  ;;  %vm214_vm0 = vcmask 261120   ;;  %s1896_s16 = smov 112  }
  0x2f   : > { %230 = vmatpush.msra.mxu0 %v209_v0  ;;  %v207_v2 = vld [vmem:[#allocation5 + $0x8] sm:$0xff]  ;;  %v206_v3 = vld [vmem:[#allocation5] sm:$0xff]  ;;  %v205_v4 = vld [vmem:[%s176_s11] sm:$0xff]  ;;  %s1897_s17 = smov 124   ;;  %s1898_s18 = smov 116   ;;  %vm261_vm1 = vcmask 1047556  }
  0x30   : > { %v1728_v5 = vld [vmem:[%s2500_s2] ss:$0 sm:$0xff]  ;;  %s1899_s21 = smov 100   ;;  %s1900_s22 = smov 120   ;;  %v1903_v11 = vmov 1983009808  }
  0x31   : > { %231 = vmatpush.msra.mxu0 %v208_v1  ;;  %s1901_s23 = smov 104   ;;  %s1902_s24 = smov 108   ;;  %v266_v12 = vunpack.c.l.s4 %v1903_v11  ;;  %v1905_v32 = vmov 1934713408   ;;  %vm645_vm2 = vcmask 31744   ;;  %vm854_vm3 = vcmask 64512  }
  0x32   : > { %s1904_s25 = smov 96   ;;  %v314_v33 = vunpack.c.l.s4 %v1905_v32  ;;  %s1906_s27 = smov 64  }
  0x33   : > { %232 = vmatpush.msra.mxu0 %v207_v2  ;;  %v2070_v18 = vunpack.c.0.s8 %v266_v12  ;;  %s1907_s28 = smov 12   ;;  %s1908_s7 = smov 4  }
  0x34   : > { %v2098_v41 = vunpack.c.0.s8 %v314_v33  ;;  %s1909_s8 = smov 8   ;;  %s1910_s10 = smov 24  }
  0x35   : > { %233 = vmatpush.msra.mxu0 %v206_v3  ;;  %s1911_s11 = smov 20   ;;  %s1912_s20 = smov 16  }
  0x36   : > { %1602 = vmatmul.msk.f32.vlgmr.msra.gmra.mxu0 %vm214_vm0, %v205_v4  ;;  %s1913_s30 = smov 28  }
  0xb3   : > { %v235_v6 = vpop.f32.mrf.mxu0 }
  0xb4   : > { %v2043_v7 = vadd.f32 %v1728_v5, %v235_v6 }
  0xb6   : > { %248 = vrot.lane.b32.xlu2 %v2043_v7, %s1896_s16  ;;  %239 = vrot.lane.b32.xlu1 %v2043_v7, %s1897_s17  ;;  %v263_v19 = vrot.slane %v2043_v7, 4  ;;  %s1628_s16 = sshll.u32 %s1958_s19, 3  ;;  %s1497_s19 = scalar_lea.sflag [#allocation4], %s2025_s5 }
  0xb7   : > { %245 = vrot.lane.b32.xlu0 %v2043_v7, %s1898_s18 }
  0xbe   : > { %257 = vrot.lane.b32.xlu2 %v2043_v7, %s1899_s21  ;;  %242 = vrot.lane.b32.xlu1 %v2043_v7, %s1900_s22  ;;  %s1507_s21 = scalar_lea.hbm %s2501_s3, %s1628_s16  ;;  %s204_s22 = scalar_lea.vmem [#allocation7], %s1599_s9 }
  0xbf   : > { %254 = vrot.lane.b32.xlu0 %v2043_v7, %s1901_s23  ;;  %s1509_s23 = sshll.u32 %s204_s22, 4  ;;  %s1510_s23 = int_to_ptr.vmem [resolvable:$true] %s1509_s23 }
  0xc7   : > { %251 = vrot.lane.b32.xlu0 %v2043_v7, %s1902_s24  ;;  %s1511_s24 = sshll.u32 %s1507_s21, 4  ;;  %s1512_s24 = int_to_ptr.hbm [resolvable:$true] %s1511_s24 }
 0x110   : > { %v2052_v8 = vpop.permute.xlu2 %248 }
 0x111   : > { %v287_v20 = vrot.slane %v2052_v8, 4 }
 0x118   : > { %v2074_v21 = vpop.permute.xlu2 %257 }
 0x119   : > { %v297_v42 = vrot.slane %v2074_v21, 4 }
 0x128   : > { %v2054_v9 = vpop.permute.xlu1 %239 }
 0x129   : > { %v275_v10 = vrot.slane %v2054_v9, 4  ;;  %v2057_v13 = vpop.permute.xlu0 %245  ;;  %375 = vrot.lane.b32.xlu0 %v2054_v9, %s1904_s25 }
 0x12a   : > { %v273_v14 = vrot.slane %v2057_v13, 4  ;;  %379 = vrot.lane.b32.xlu1 %v2057_v13, %s1904_s25  ;;  %v1713_v15 = vpack.i.bf16 %v2057_v13, %v2054_v9 }
 0x12b   : > { %v276_v16 = vsel %vm261_vm1, %v2057_v13, %v275_v10 }
 0x12c   : > { %v274_v17 = vsel %vm261_vm1, %v273_v14, %v2054_v9  ;;  %v284_v36 = vperm.slane %v276_v16, %v2070_v18 }
 0x12d   : > { %v280_v23 = vperm.slane %v274_v17, %v2070_v18 }
 0x12e   : > { %v321_v46 = vrot.slane %v284_v36, 4 }
 0x12f   : > { %v309_v38 = vrot.slane %v280_v23, 4 }
 0x130   : > { %v243_v22 = vpop.permute.xlu1 %242 }
 0x131   : > { %v260_v24 = vrot.slane %v243_v22, 4  ;;  %v264_v25 = vsel %vm261_vm1, %v243_v22, %v263_v19  ;;  %v2078_v26 = vpop.permute.xlu0 %254  ;;  %387 = vrot.lane.b32.xlu0 %v2074_v21, %s1904_s25  ;;  %v1708_v62 = vpack.i.bf16 %v243_v22, %v2043_v7 }
 0x132   : > { %v272_v27 = vperm.slane %v264_v25, %v2070_v18  ;;  %v285_v28 = vrot.slane %v2078_v26, 4  ;;  %v288_v29 = vsel %vm261_vm1, %v2078_v26, %v287_v20  ;;  %377 = vrot.lane.b32.xlu1 %v243_v22, %s1904_s25  ;;  %385 = vrot.lane.b32.xlu2 %v2078_v26, %s1904_s25  ;;  %v1718_v30 = vpack.i.bf16 %v2078_v26, %v2052_v8 }
 0x133   : > { %v262_v31 = vsel %vm261_vm1, %v260_v24, %v2043_v7  ;;  %v296_v43 = vperm.slane %v288_v29, %v2070_v18 }
 0x134   : > { %v268_v34 = vperm.slane %v262_v31, %v2070_v18  ;;  %v286_v35 = vsel %vm261_vm1, %v285_v28, %v2052_v8  ;;  %v323_v37 = vrot.slane %v272_v27, 4  ;;  %v322_v55 = vsel %vm261_vm1, %v321_v46, %v272_v27 }
 0x135   : > { %v292_v40 = vperm.slane %v286_v35, %v2070_v18  ;;  %v347_v56 = vrot.slane %v296_v43, 4  ;;  %v328_v1 = vperm.slane %v322_v55, %v2098_v41 }
 0x136   : > { %v311_v39 = vrot.slane %v268_v34, 4  ;;  %v310_v44 = vsel %vm261_vm1, %v309_v38, %v268_v34  ;;  %v324_v51 = vsel %vm261_vm1, %v284_v36, %v323_v37 }
 0x137   : > { %v335_v52 = vrot.slane %v292_v40, 4  ;;  %v316_v54 = vperm.slane %v310_v44, %v2098_v41  ;;  %v332_v61 = vperm.slane %v324_v51, %v2098_v41 }
 0x138   : > { %v312_v45 = vsel %vm261_vm1, %v280_v23, %v311_v39  ;;  %v367_v23 = vrot.slane %v328_v1, 4 }
 0x139   : > { %v2104_v47 = vpop.permute.xlu0 %251  ;;  %v320_v50 = vperm.slane %v312_v45, %v2098_v41  ;;  %v359_v4 = vrot.slane %v316_v54, 4 }
 0x13a   : > { %v298_v48 = vsel %vm261_vm1, %v297_v42, %v2104_v47  ;;  %v299_v49 = vrot.slane %v2104_v47, 4  ;;  %373 = vrot.lane.b32.xlu1 %v2043_v7, %s1904_s25  ;;  %381 = vrot.lane.b32.xlu2 %v2052_v8, %s1904_s25  ;;  %v371_v7 = vrot.slane %v332_v61, 4 }
 0x13b   : > { %v304_v53 = vperm.slane %v298_v48, %v2070_v18  ;;  %v363_v0 = vrot.slane %v320_v50, 4 }
 0x13c   : > { %v300_v57 = vsel %vm261_vm1, %v2074_v21, %v299_v49 }
 0x13d   : > { %v308_v58 = vperm.slane %v300_v57, %v2070_v18  ;;  %v333_v59 = vrot.slane %v304_v53, 4  ;;  %v336_v60 = vsel %vm261_vm1, %v304_v53, %v335_v52 }
 0x13e   : > { %v344_v63 = vperm.slane %v336_v60, %v2098_v41 }
 0x13f   : > { %v345_v2 = vrot.slane %v308_v58, 4  ;;  %v334_v3 = vsel %vm261_vm1, %v333_v59, %v292_v40  ;;  %v348_v5 = vsel %vm261_vm1, %v308_v58, %v347_v56 }
 0x140   : > { %v340_v6 = vperm.slane %v334_v3, %v2098_v41  ;;  %v361_v10 = vrot.slane %v344_v63, 4  ;;  %v356_v11 = vperm.slane %v348_v5, %v2098_v41  ;;  %v2131_v12 = vsel %vm261_vm1, %v344_v63, %v363_v0 }
 0x141   : > { %v346_v14 = vsel %vm261_vm1, %v345_v2, %v296_v43 }
 0x142   : > { %1709 = vrot.lane.b32.xlu1 %v1708_v62, %s1906_s27  ;;  %383 = vrot.lane.b32.xlu2 %v2104_v47, %s1904_s25  ;;  %v357_v16 = vrot.slane %v340_v6, 4  ;;  %v2138_v17 = vsel %vm261_vm1, %v340_v6, %v359_v4  ;;  %v2141_v19 = vsel %vm261_vm1, %v361_v10, %v320_v50  ;;  %v369_v20 = vrot.slane %v356_v11, 4  ;;  %s1835_s25 = sshra.s32 %s1512_s24, 4  ;;  %s1836_s25 = int_to_ptr.hbm [resolvable:$true] %s1835_s25 }
 0x143   : > { %v352_v22 = vperm.slane %v346_v14, %v2098_v41  ;;  %v2145_v24 = vsel %vm261_vm1, %v356_v11, %v371_v7  ;;  %p1842_p12 = scmp.lt.s32.totalorder %s1836_s25, %s2501_s3 }
 0x144   : > { %v2148_v25 = vsel %vm261_vm1, %v357_v16, %v316_v54  ;;  %v2151_v27 = vsel %vm261_vm1, %v369_v20, %v332_v61 }
 0x145   : > { %v365_v28 = vrot.slane %v352_v22, 4  ;;  %v2154_v29 = vsel %vm261_vm1, %v352_v22, %v367_v23 }
 0x147   : > { %v2157_v31 = vsel %vm261_vm1, %v365_v28, %v328_v1 }
 0x18c   : > { %v386_v32 = vpop.permute.xlu2 %385 }
 0x18d   : > { %v421_v37 = vrot.slane %v386_v32, 4 }
 0x194   : > { %v382_v33 = vpop.permute.xlu2 %381 }
 0x195   : > { %v423_v38 = vrot.slane %v382_v33, 4  ;;  %v422_v39 = vsel %vm261_vm1, %v421_v37, %v382_v33 }
 0x196   : > { %v428_v50 = vperm.slane %v422_v39, %v2070_v18 }
 0x197   : > { %v424_v49 = vsel %vm261_vm1, %v386_v32, %v423_v38 }
 0x198   : > { %v432_v55 = vperm.slane %v424_v49, %v2070_v18  ;;  %v471_v57 = vrot.slane %v428_v50, 4 }
 0x19a   : > { %v483_v1 = vrot.slane %v432_v55, 4 }
 0x19b   : > { %v376_v34 = vpop.permute.xlu0 %375 }
 0x19c   : > { %v380_v35 = vpop.permute.xlu1 %379  ;;  %v384_v36 = vpop.permute.xlu2 %383  ;;  %v411_v44 = vrot.slane %v376_v34, 4 }
 0x19d   : > { %v435_v40 = vrot.slane %v384_v36, 4  ;;  %v409_v42 = vrot.slane %v380_v35, 4 }
 0x19e   : > { %v412_v56 = vsel %vm261_vm1, %v380_v35, %v411_v44 }
 0x19f   : > { %v410_v53 = vsel %vm261_vm1, %v409_v42, %v376_v34  ;;  %v420_v61 = vperm.slane %v412_v56, %v2070_v18 }
 0x1a0   : > { %v416_v60 = vperm.slane %v410_v53, %v2070_v18 }
 0x1a1   : > { %v457_v16 = vrot.slane %v420_v61, 4 }
 0x1a2   : > { %v445_v10 = vrot.slane %v416_v60, 4 }
 0x1a3   : > { %v388_v43 = vpop.permute.xlu0 %387 }
 0x1a4   : > { %v378_v45 = vpop.permute.xlu1 %377  ;;  %v433_v46 = vrot.slane %v388_v43, 4  ;;  %v436_v48 = vsel %vm261_vm1, %v388_v43, %v435_v40 }
 0x1a5   : > { %v444_v51 = vperm.slane %v436_v48, %v2070_v18  ;;  %v397_v62 = vrot.slane %v378_v45, 4 }
 0x1a6   : > { %v434_v52 = vsel %vm261_vm1, %v433_v46, %v384_v36 }
 0x1a7   : > { %v440_v54 = vperm.slane %v434_v52, %v2070_v18  ;;  %v481_v59 = vrot.slane %v444_v51, 4  ;;  %v484_v11 = vsel %vm261_vm1, %v444_v51, %v483_v1 }
 0x1a8   : > { %v492_v35 = vperm.slane %v484_v11, %v2098_v41 }
 0x1a9   : > { %v469_v58 = vrot.slane %v440_v54, 4  ;;  %v472_v0 = vsel %vm261_vm1, %v440_v54, %v471_v57  ;;  %v482_v6 = vsel %vm261_vm1, %v481_v59, %v432_v55 }
 0x1aa   : > { %v480_v14 = vperm.slane %v472_v0, %v2098_v41  ;;  %v488_v32 = vperm.slane %v482_v6, %v2098_v41 }
 0x1ab   : > { %v470_v63 = vsel %vm261_vm1, %v469_v58, %v428_v50  ;;  %v505_v50 = vrot.slane %v492_v35, 4 }
 0x1ac   : > { %v374_v2 = vpop.permute.xlu1 %373  ;;  %v476_v5 = vperm.slane %v470_v63, %v2098_v41  ;;  %v497_v38 = vrot.slane %v480_v14, 4 }
 0x1ad   : > { %v398_v3 = vsel %vm261_vm1, %v397_v62, %v374_v2  ;;  %v399_v4 = vrot.slane %v374_v2, 4 }
 0x1ae   : > { %v404_v7 = vperm.slane %v398_v3, %v2070_v18  ;;  %v493_v34 = vrot.slane %v476_v5, 4 }
 0x1af   : > { %v400_v20 = vsel %vm261_vm1, %v378_v45, %v399_v4  ;;  %v501_v45 = vrot.slane %v488_v32, 4  ;;  %v1723_v4 = vpack.i.bf16 %v2074_v21, %v2104_v47 }
 0x1b0   : > { %v408_v22 = vperm.slane %v400_v20, %v2070_v18  ;;  %v447_v23 = vrot.slane %v404_v7, 4  ;;  %v446_v28 = vsel %vm261_vm1, %v445_v10, %v404_v7 }
 0x1b1   : > { %v452_v33 = vperm.slane %v446_v28, %v2098_v41 }
 0x1b2   : > { %v459_v36 = vrot.slane %v408_v22, 4  ;;  %v448_v37 = vsel %vm261_vm1, %v416_v60, %v447_v23  ;;  %v458_v39 = vsel %vm261_vm1, %v457_v16, %v408_v22 }
 0x1b3   : > { %v494_v40 = vsel %vm261_vm1, %v493_v34, %v452_v33  ;;  %v495_v42 = vrot.slane %v452_v33, 4  ;;  %v456_v43 = vperm.slane %v448_v37, %v2098_v41  ;;  %v464_v44 = vperm.slane %v458_v39, %v2098_v41 }
 0x1b4   : > { %1603 = vmatpush.xpose.msk.msra.mxu1 %vm645_vm2, %v494_v40  ;;  %v460_v46 = vsel %vm261_vm1, %v420_v61, %v459_v36  ;;  %v1710_v6 = vpop.permute.xlu1 %1709 }
 0x1b5   : > { %v496_v48 = vsel %vm261_vm1, %v476_v5, %v495_v42  ;;  %v498_v49 = vsel %vm261_vm1, %v497_v38, %v456_v43  ;;  %v502_v51 = vsel %vm261_vm1, %v501_v45, %v464_v44  ;;  %v499_v52 = vrot.slane %v456_v43, 4 }
 0x1b6   : > { %1605 = vmatpush.xpose.msk.msra.mxu2 %vm645_vm2, %v496_v48  ;;  %1607 = vmatpush.xpose.msk.msra.mxu3 %vm645_vm2, %v498_v49  ;;  %v503_v53 = vrot.slane %v464_v44, 4  ;;  %v468_v54 = vperm.slane %v460_v46, %v2098_v41  ;;  %v1712_v40 = vunpack.i.h.bf16 %v1710_v6  ;;  %v1711_v44 = vunpack.i.l.bf16 %v1710_v6 }
 0x1b7   : > { %1604 = vmatmul.msk.f32.vlgmr.msra.gmra.mxu1 %vm645_vm2, %v2148_v25  ;;  %v500_v55 = vsel %vm261_vm1, %v480_v14, %v499_v52 }
 0x1b8   : > { %v504_v56 = vsel %vm261_vm1, %v488_v32, %v503_v53  ;;  %v506_v57 = vsel %vm261_vm1, %v505_v50, %v468_v54  ;;  %v507_v58 = vrot.slane %v468_v54, 4  ;;  %1609 = vmatpush.xpose.msk.msrb.mxu1 %vm645_vm2, %v500_v55  ;;  %v533_v50 = vrot.slane %v1712_v40, 4 }
 0x1b9   : > { %1615 = vmatpush.xpose.msk.msrb.mxu0 %vm645_vm2, %v506_v57  ;;  %1606 = vmatmul.msk.f32.vlgmr.msra.gmra.mxu2 %vm645_vm2, %v2138_v17  ;;  %v535_v53 = vrot.slane %v1711_v44, 4 }
 0x1ba   : > { %1611 = vmatpush.xpose.msk.msrb.mxu2 %vm645_vm2, %v502_v51  ;;  %1613 = vmatpush.xpose.msk.msrb.mxu3 %vm645_vm2, %v504_v56  ;;  %v508_v25 = vsel %vm261_vm1, %v492_v35, %v507_v58 }
 0x1bb   : > { %1608 = vmatmul.msk.f32.vlgmr.msra.gmra.mxu3 %vm645_vm2, %v2141_v19 }
 0x1bc   : > { %1617 = vmatpush.xpose.msk.msra.mxu1 %vm645_vm2, %v508_v25  ;;  %1616 = vmatmul.msk.f32.vlgmr.msrb.gmra.mxu0 %vm645_vm2, %v2151_v27  ;;  %v534_v25 = vsel %vm261_vm1, %v533_v50, %v1711_v44 }
 0x1bf   : > { %1610 = vmatmul.msk.f32.vlgmr.msrb.gmra.mxu1 %vm645_vm2, %v2131_v12 }
 0x1c1   : > { %1612 = vmatmul.msk.f32.vlgmr.msrb.gmra.mxu2 %vm645_vm2, %v2157_v31 }
 0x1c3   : > { %1614 = vmatmul.msk.f32.vlgmr.msrb.gmra.mxu3 %vm645_vm2, %v2154_v29 }
 0x1c7   : > { %1618 = vmatmul.msk.f32.vlgmr.msra.gmra.mxu1 %vm645_vm2, %v2145_v24 }
 0x234   : > { %v669_v17 = vpop.f32.mrf.mxu1 }
 0x235   : > { %v855_v19 = vsel %vm854_vm3, %v669_v17, -inf }
 0x236   : > { %856 = vmax.xlane.f32.xlu0 %v855_v19 }
 0x239   : > { %v2224_v59 = vpop.f32.mrf.mxu0 }
 0x23a   : > { %v873_v27 = vsel %vm854_vm3, %v2224_v59, -inf }
 0x23b   : > { %874 = vmax.xlane.f32.xlu2 %v873_v27 }
 0x23c   : > { %v695_v12 = vpop.f32.mrf.mxu2  ;;  %v747_v29 = vpop.f32.mrf.mxu1 }
 0x23d   : > { %v858_v31 = vsel %vm854_vm3, %v695_v12, -inf  ;;  %v864_v2 = vsel %vm854_vm3, %v747_v29, -inf }
 0x23e   : > { %v721_v60 = vpop.f32.mrf.mxu3  ;;  %859 = vmax.xlane.f32.xlu1 %v858_v31  ;;  %v540_v31 = vperm.slane %v534_v25, %v2070_v18 }
 0x23f   : > { %v861_v61 = vsel %vm854_vm3, %v721_v60, -inf }
 0x243   : > { %862 = vmax.xlane.f32.xlu2 %v861_v61 }
 0x244   : > { %v773_v24 = vpop.f32.mrf.mxu2  ;;  %v851_v1 = vpop.f32.mrf.mxu1 }
 0x245   : > { %v867_v63 = vsel %vm854_vm3, %v773_v24, -inf  ;;  %v876_v3 = vsel %vm854_vm3, %v851_v1, -inf }
 0x246   : > { %v799_v62 = vpop.f32.mrf.mxu3  ;;  %868 = vmax.xlane.f32.xlu0 %v867_v63 }
 0x247   : > { %v870_v0 = vsel %vm854_vm3, %v799_v62, -inf }
 0x248   : > { %871 = vmax.xlane.f32.xlu1 %v870_v0  ;;  %v583_v0 = vrot.slane %v540_v31, 4 }
 0x24b   : > { %865 = vmax.xlane.f32.xlu2 %v864_v2 }
 0x24e   : > { %877 = vmax.xlane.f32.xlu0 %v876_v3 }
 0x261   : > { %1724 = vrot.lane.b32.xlu1 %v1723_v4, %s1906_s27 }
 0x262   : > { %1719 = vrot.lane.b32.xlu0 %v1718_v30, %s1906_s27 }
 0x263   : > { %1714 = vrot.lane.b32.xlu2 %v1713_v15, %s1906_s27  ;;  %s1837_s27 = scalar_lea.hbm %s1836_s25, 8 }
 0x264   : > { %p1838_p1 = scmp.ne.s32.totalorder %s1836_s25, %s1837_s27 }
 0x266   : > { %p1839_p3 = pnand %p1838_p1, %p1994_p13 }
 0x268   : > { %p1840_p5 = pneg %p1839_p3 }
 0x2a9   : > { %v857_v5 = vpop.xlane.xlu0 %856 }
 0x2aa   : > { %v879_v10 = vsub.f32 %v669_v17, %v857_v5 }
 0x2ac   : > { %v887_v11 = vmul.f32 1.442695, %v879_v10 }
 0x2ae   : > { %1729 = vpow2.f32 %v887_v11  ;;  %v875_v7 = vpop.xlane.xlu2 %874 }
 0x2af   : > { %v885_v37 = vsub.f32 %v2224_v59, %v875_v7  ;;  %v536_v59 = vsel %vm261_vm1, %v1712_v40, %v535_v53 }
 0x2b0   : > { %v544_v61 = vperm.slane %v536_v59, %v2070_v18 }
 0x2b1   : > { %v860_v14 = vpop.xlane.xlu1 %859  ;;  %v899_v48 = vmul.f32 1.442695, %v885_v37 }
 0x2b2   : > { %v880_v21 = vsub.f32 %v695_v12, %v860_v14 }
 0x2b4   : > { %v2245_v47 = vpop.eup %1729  ;;  %v889_v16 = vmul.f32 1.442695, %v880_v21 }
 0x2b5   : > { %v903_v8 = vsel %vm854_vm3, %v2245_v47, 0.0 }
 0x2b6   : > { %904 = vadd.xlane.f32.xlu0 %v903_v8  ;;  %1731 = vpow2.f32 %v889_v16  ;;  %v863_v26 = vpop.xlane.xlu2 %862 }
 0x2b7   : > { %v881_v30 = vsub.f32 %v721_v60, %v863_v26 }
 0x2b9   : > { %v891_v9 = vmul.f32 1.442695, %v881_v30  ;;  %v869_v13 = vpop.xlane.xlu0 %868 }
 0x2ba   : > { %v883_v20 = vsub.f32 %v773_v24, %v869_v13 }
 0x2bb   : > { %v872_v15 = vpop.xlane.xlu1 %871  ;;  %1733 = vpow2.f32 %v891_v9 }
 0x2bc   : > { %v884_v22 = vsub.f32 %v799_v62, %v872_v15  ;;  %v2249_v23 = vpop.eup %1731  ;;  %v895_v28 = vmul.f32 1.442695, %v883_v20 }
 0x2bd   : > { %v906_v33 = vsel %vm854_vm3, %v2249_v23, 0.0 }
 0x2be   : > { %v897_v32 = vmul.f32 1.442695, %v884_v22  ;;  %1735 = vpow2.f32 %v895_v28  ;;  %v866_v34 = vpop.xlane.xlu2 %865  ;;  %907 = vadd.xlane.f32.xlu2 %v906_v33 }
 0x2bf   : > { %v882_v35 = vsub.f32 %v747_v29, %v866_v34 }
 0x2c0   : > { %1737 = vpow2.f32 %v897_v32 }
 0x2c1   : > { %v2253_v36 = vpop.eup %1733  ;;  %v893_v38 = vmul.f32 1.442695, %v882_v35  ;;  %v878_v39 = vpop.xlane.xlu0 %877 }
 0x2c2   : > { %v886_v42 = vsub.f32 %v851_v1, %v878_v39  ;;  %v909_v43 = vsel %vm854_vm3, %v2253_v36, 0.0  ;;  %v595_v1 = vrot.slane %v544_v61, 4 }
 0x2c3   : > { %1739 = vpow2.f32 %v893_v38  ;;  %910 = vadd.xlane.f32.xlu1 %v909_v43 }
 0x2c4   : > { %v2258_v45 = vpop.eup %1735  ;;  %v901_v46 = vmul.f32 1.442695, %v886_v42 }
 0x2c5   : > { %v915_v49 = vsel %vm854_vm3, %v2258_v45, 0.0 }
 0x2c6   : > { %1741 = vpow2.f32 %v901_v46  ;;  %v1715_v51 = vpop.permute.xlu2 %1714  ;;  %916 = vadd.xlane.f32.xlu2 %v915_v49  ;;  %v2262_v52 = vpop.eup %1737 }
 0x2c7   : > { %v1717_v54 = vunpack.i.h.bf16 %v1715_v51  ;;  %v1716_v55 = vunpack.i.l.bf16 %v1715_v51  ;;  %1743 = vpow2.f32 %v899_v48  ;;  %v918_v17 = vsel %vm854_vm3, %v2262_v52, 0.0 }
 0x2c9   : > { %v2264_v56 = vpop.eup %1739  ;;  %v545_v57 = vrot.slane %v1717_v54, 4  ;;  %v547_v58 = vrot.slane %v1716_v55, 4 }
 0x2ca   : > { %v912_v19 = vsel %vm854_vm3, %v2264_v56, 0.0 }
 0x2cb   : > { %v546_v27 = vsel %vm261_vm1, %v545_v57, %v1716_v55  ;;  %v548_v12 = vsel %vm261_vm1, %v1717_v54, %v547_v58  ;;  %919 = vadd.xlane.f32.xlu1 %v918_v17  ;;  %913 = vadd.xlane.f32.xlu0 %v912_v19 }
 0x2cc   : > { %v2274_v60 = vpop.eup %1741  ;;  %v552_v24 = vperm.slane %v546_v27, %v2070_v18  ;;  %v556_v62 = vperm.slane %v548_v12, %v2070_v18 }
 0x2cd   : > { %v924_v29 = vsel %vm854_vm3, %v2274_v60, 0.0  ;;  %v2282_v63 = vpop.eup %1743 }
 0x2ce   : > { %925 = vadd.xlane.f32.xlu2 %v924_v29  ;;  %v581_v2 = vrot.slane %v552_v24, 4  ;;  %v593_v3 = vrot.slane %v556_v62, 4  ;;  %v921_v5 = vsel %vm854_vm3, %v2282_v63, 0.0  ;;  %v584_v11 = vsel %vm261_vm1, %v552_v24, %v583_v0 }
 0x2cf   : > { %v596_v7 = vsel %vm261_vm1, %v556_v62, %v595_v1  ;;  %v592_v28 = vperm.slane %v584_v11, %v2098_v41 }
 0x2d0   : > { %v582_v30 = vsel %vm261_vm1, %v581_v2, %v540_v31  ;;  %v594_v9 = vsel %vm261_vm1, %v593_v3, %v544_v61  ;;  %v604_v32 = vperm.slane %v596_v7, %v2098_v41 }
 0x2d1   : > { %v588_v35 = vperm.slane %v582_v30, %v2098_v41  ;;  %v600_v37 = vperm.slane %v594_v9, %v2098_v41  ;;  %v635_v53 = vrot.slane %v592_v28, 4 }
 0x2d2   : > { %v643_v58 = vrot.slane %v604_v32, 4 }
 0x2d3   : > { %v1725_v4 = vpop.permute.xlu1 %1724  ;;  %922 = vadd.xlane.f32.xlu0 %v921_v5  ;;  %v631_v51 = vrot.slane %v588_v35, 4  ;;  %v639_v57 = vrot.slane %v600_v37, 4 }
 0x2d4   : > { %v1727_v6 = vunpack.i.h.bf16 %v1725_v4  ;;  %v1726_v10 = vunpack.i.l.bf16 %v1725_v4  ;;  %v1720_v14 = vpop.permute.xlu0 %1719 }
 0x2d5   : > { %v1722_v8 = vunpack.i.h.bf16 %v1720_v14  ;;  %v1721_v26 = vunpack.i.l.bf16 %v1720_v14 }
 0x2d6   : > { %v569_v21 = vrot.slane %v1727_v6, 4  ;;  %v571_v16 = vrot.slane %v1726_v10, 4 }
 0x2d7   : > { %v557_v20 = vrot.slane %v1722_v8, 4  ;;  %v559_v22 = vrot.slane %v1721_v26, 4 }
 0x2d8   : > { %v570_v13 = vsel %vm261_vm1, %v569_v21, %v1726_v10  ;;  %v572_v15 = vsel %vm261_vm1, %v1727_v6, %v571_v16 }
 0x2d9   : > { %v576_v33 = vperm.slane %v570_v13, %v2070_v18  ;;  %v580_v34 = vperm.slane %v572_v15, %v2070_v18  ;;  %v558_v38 = vsel %vm261_vm1, %v557_v20, %v1721_v26  ;;  %v560_v39 = vsel %vm261_vm1, %v1722_v8, %v559_v22 }
 0x2da   : > { %v564_v43 = vperm.slane %v558_v38, %v2070_v18  ;;  %v568_v44 = vperm.slane %v560_v39, %v2070_v18 }
 0x2db   : > { %v605_v40 = vrot.slane %v576_v33, 4  ;;  %v617_v42 = vrot.slane %v580_v34, 4 }
 0x2dc   : > { %v607_v48 = vrot.slane %v564_v43, 4  ;;  %v619_v50 = vrot.slane %v568_v44, 4 }
 0x2dd   : > { %v606_v46 = vsel %vm261_vm1, %v605_v40, %v564_v43  ;;  %v618_v49 = vsel %vm261_vm1, %v617_v42, %v568_v44 }
 0x2de   : > { %v612_v54 = vperm.slane %v606_v46, %v2098_v41  ;;  %v624_v55 = vperm.slane %v618_v49, %v2098_v41  ;;  %v608_v25 = vsel %vm261_vm1, %v576_v33, %v607_v48  ;;  %v620_v17 = vsel %vm261_vm1, %v580_v34, %v619_v50 }
 0x2df   : > { %v616_v19 = vperm.slane %v608_v25, %v2098_v41  ;;  %v628_v59 = vperm.slane %v620_v17, %v2098_v41 }
 0x2e0   : > { %v629_v27 = vrot.slane %v612_v54, 4  ;;  %v632_v12 = vsel %vm261_vm1, %v612_v54, %v631_v51  ;;  %v637_v31 = vrot.slane %v624_v55, 4  ;;  %v640_v29 = vsel %vm261_vm1, %v624_v55, %v639_v57 }
 0x2e1   : > { %v1061_v61 = vrot.slane %v632_v12, 4  ;;  %v633_v24 = vrot.slane %v616_v19, 4  ;;  %v636_v62 = vsel %vm261_vm1, %v616_v19, %v635_v53  ;;  %v641_v0 = vrot.slane %v628_v59, 4 }
 0x2e2   : > { %v644_v1 = vsel %vm261_vm1, %v628_v59, %v643_v58  ;;  %v1059_v2 = vrot.slane %v636_v62, 4  ;;  %v1085_v4 = vrot.slane %v640_v29, 4  ;;  %v630_v5 = vsel %vm261_vm1, %v629_v27, %v588_v35 }
 0x2e3   : > { %v1083_v3 = vrot.slane %v644_v1, 4  ;;  %v642_v6 = vsel %vm261_vm1, %v641_v0, %v604_v32  ;;  %v634_v10 = vsel %vm261_vm1, %v633_v24, %v592_v28  ;;  %v638_v11 = vsel %vm261_vm1, %v637_v31, %v600_v37 }
 0x2e4   : > { %v1049_v7 = vrot.slane %v630_v5, 4  ;;  %v1047_v14 = vrot.slane %v634_v10, 4  ;;  %v1060_v21 = vsel %vm261_vm1, %v1059_v2, %v632_v12  ;;  %v1071_v16 = vrot.slane %v642_v6, 4 }
 0x2e5   : > { %v1073_v8 = vrot.slane %v638_v11, 4  ;;  %v1066_v26 = vperm.slane %v1060_v21, %v2070_v18  ;;  %v1084_v30 = vsel %vm261_vm1, %v1083_v3, %v640_v29  ;;  %v1062_v13 = vsel %vm261_vm1, %v636_v62, %v1061_v61 }
 0x2e6   : > { %v1050_v9 = vsel %vm261_vm1, %v634_v10, %v1049_v7  ;;  %v1048_v15 = vsel %vm261_vm1, %v1047_v14, %v630_v5  ;;  %v1072_v20 = vsel %vm261_vm1, %v1071_v16, %v638_v11  ;;  %v1090_v22 = vperm.slane %v1084_v30, %v2070_v18 }
 0x2e7   : > { %v1058_v28 = vperm.slane %v1050_v9, %v2070_v18  ;;  %v1054_v32 = vperm.slane %v1048_v15, %v2070_v18  ;;  %v1078_v33 = vperm.slane %v1072_v20, %v2070_v18  ;;  %v1095_v34 = vrot.slane %v1066_v26, 4 }
 0x2e8   : > { %v1070_v35 = vperm.slane %v1062_v13, %v2070_v18  ;;  %v1119_v37 = vrot.slane %v1090_v22, 4  ;;  %v1074_v38 = vsel %vm261_vm1, %v642_v6, %v1073_v8  ;;  %v1086_v39 = vsel %vm261_vm1, %v644_v1, %v1085_v4 }
 0x2e9   : > { %v1109_v40 = vrot.slane %v1058_v28, 4  ;;  %v1096_v42 = vsel %vm261_vm1, %v1095_v34, %v1054_v32  ;;  %v1082_v43 = vperm.slane %v1074_v38, %v2070_v18  ;;  %v1094_v44 = vperm.slane %v1086_v39, %v2070_v18 }
 0x2ea   : > { %v1107_v46 = vrot.slane %v1070_v35, 4  ;;  %v1102_v48 = vperm.slane %v1096_v42, %v2098_v41  ;;  %v1120_v49 = vsel %vm261_vm1, %v1119_v37, %v1078_v33  ;;  %v1097_v50 = vrot.slane %v1054_v32, 4 }
 0x2eb   : > { %v1121_v51 = vrot.slane %v1078_v33, 4  ;;  %v1126_v53 = vperm.slane %v1120_v49, %v2098_v41  ;;  %v1131_v55 = vrot.slane %v1094_v44, 4  ;;  %v1110_v57 = vsel %vm261_vm1, %v1070_v35, %v1109_v40 }
 0x2ec   : > { %v1108_v54 = vsel %vm261_vm1, %v1107_v46, %v1058_v28  ;;  %v1145_v58 = vrot.slane %v1102_v48, 4  ;;  %v1098_v17 = vsel %vm261_vm1, %v1066_v26, %v1097_v50  ;;  %v1118_v62 = vperm.slane %v1110_v57, %v2098_v41 }
 0x2ed   : > { %v1114_v25 = vperm.slane %v1108_v54, %v2098_v41  ;;  %v1122_v19 = vsel %vm261_vm1, %v1090_v22, %v1121_v51  ;;  %v1143_v59 = vrot.slane %v1126_v53, 4  ;;  %v1132_v27 = vsel %vm261_vm1, %v1131_v55, %v1082_v43 }
 0x2ee   : > { %v1106_v12 = vperm.slane %v1098_v17, %v2098_v41  ;;  %v1130_v31 = vperm.slane %v1122_v19, %v2098_v41  ;;  %v1146_v29 = vsel %vm261_vm1, %v1126_v53, %v1145_v58  ;;  %v1138_v61 = vperm.slane %v1132_v27, %v2098_v41 }
 0x2ef   : > { %v1153_v24 = vrot.slane %v1114_v25, 4  ;;  %v1144_v0 = vsel %vm261_vm1, %v1143_v59, %v1102_v48  ;;  %1200 = vmatpush.msra.mxu3 %v1146_v29  ;;  %v1133_v3 = vrot.slane %v1082_v43, 4  ;;  %v1157_v6 = vrot.slane %v1118_v62, 4 }
 0x2f0   : > { %v1147_v1 = vrot.slane %v1130_v31, 4  ;;  %v1149_v2 = vrot.slane %v1106_v12, 4  ;;  %1177 = vmatpush.msra.mxu2 %v1144_v0  ;;  %v1151_v4 = vrot.slane %v1138_v61, 4 }
 0x2f1   : > { %v1154_v5 = vsel %vm261_vm1, %v1138_v61, %v1153_v24  ;;  %v1134_v7 = vsel %vm261_vm1, %v1094_v44, %v1133_v3 }
 0x2f2   : > { %1292 = vmatpush.msrb.mxu3 %v1154_v5  ;;  %v1148_v10 = vsel %vm261_vm1, %v1147_v1, %v1106_v12  ;;  %v1150_v11 = vsel %vm261_vm1, %v1130_v31, %v1149_v2  ;;  %v1152_v14 = vsel %vm261_vm1, %v1151_v4, %v1114_v25  ;;  %v1142_v21 = vperm.slane %v1134_v7, %v2098_v41 }
 0x2f3   : > { %1223 = vmatpush.msra.mxu0 %v1148_v10  ;;  %1246 = vmatpush.msrb.mxu1 %v1150_v11 }
 0x2f4   : > { %1269 = vmatpush.msrb.mxu2 %v1152_v14  ;;  %v1155_v16 = vrot.slane %v1142_v21, 4  ;;  %v1158_v8 = vsel %vm261_vm1, %v1142_v21, %v1157_v6 }
 0x2f5   : > { %1338 = vmatpush.msra.mxu1 %v1158_v8 }
 0x2f6   : > { %v1156_v26 = vsel %vm261_vm1, %v1155_v16, %v1118_v62 }
 0x2f7   : > { %1315 = vmatpush.msrb.mxu0 %v1156_v26 }
 0x329   : > { %v905_v30 = vpop.xlane.xlu0 %904 }
 0x32a   : > { %1745 = vrcp.f32 %v905_v30  ;;  %v938_v22 = vand.u32 2147483648, %v905_v30  ;;  %v936_v32 = vand.u32 2147483647, %v905_v30  ;;  %vm932_vm5 = vweird.f32 %v905_v30 }
 0x32c   : > { %v939_v35 = vor.u32 1.1754944e-38, %v938_v22  ;;  %vm937_vm7 = vcmp.eq.f32.partialorder %v936_v32, 8.507059e+37 }
 0x330   : > { %v1746_v9 = vpop.eup %1745 }
 0x331   : > { %v928_v13 = vmul.f32 %v1746_v9, %v905_v30  ;;  %v908_v15 = vpop.xlane.xlu2 %907  ;;  %vm933_vm4 = vweird.f32 %v1746_v9 }
 0x332   : > { %1747 = vrcp.f32 %v908_v15  ;;  %vm934_vm6 = vmor %vm932_vm5, %vm933_vm4  ;;  %v952_v46 = vand.u32 2147483648, %v908_v15  ;;  %v950_v50 = vand.u32 2147483647, %v908_v15  ;;  %vm946_vm9 = vweird.f32 %v908_v15 }
 0x333   : > { %v929_v20 = vsub.f32 1.0, %v928_v13 }
 0x334   : > { %v953_v58 = vor.u32 1.1754944e-38, %v952_v46  ;;  %vm951_vm11 = vcmp.eq.f32.partialorder %v950_v50, 8.507059e+37 }
 0x335   : > { %v930_v28 = vmul.f32 %v1746_v9, %v929_v20 }
 0x336   : > { %v911_v34 = vpop.xlane.xlu1 %910 }
 0x337   : > { %v931_v33 = vadd.f32 %v1746_v9, %v930_v28  ;;  %1749 = vrcp.f32 %v911_v34  ;;  %v964_v25 = vand.u32 2147483647, %v911_v34  ;;  %v966_v19 = vand.u32 2147483648, %v911_v34 }
 0x338   : > { %v1748_v37 = vpop.eup %1747  ;;  %vm960_vm13 = vweird.f32 %v911_v34 }
 0x339   : > { %v935_v38 = vsel %vm934_vm6, %v1746_v9, %v931_v33  ;;  %v942_v40 = vmul.f32 %v1748_v37, %v908_v15  ;;  %v917_v42 = vpop.xlane.xlu2 %916  ;;  %vm947_vm8 = vweird.f32 %v1748_v37  ;;  %vm2369_vm14 = vcmp.eq.f32.partialorder %v964_v25, 8.507059e+37 }
 0x33a   : > { %v940_v39 = vsel %vm937_vm7, %v939_v35, %v935_v38  ;;  %1751 = vrcp.f32 %v917_v42  ;;  %vm948_vm10 = vmor %vm946_vm9, %vm947_vm8  ;;  %v992_v29 = vand.u32 2147483647, %v917_v42  ;;  %v994_v24 = vand.u32 2147483648, %v917_v42 }
 0x33b   : > { %v943_v43 = vsub.f32 1.0, %v942_v40  ;;  %v1039_v44 = vmul.f32 %v2245_v47, %v940_v39  ;;  %v967_v3 = vor.u32 1.1754944e-38, %v966_v19  ;;  %vm988_vm5 = vweird.f32 %v917_v42 }
 0x33c   : > { %vm2380_vm6 = vcmp.eq.f32.partialorder %v992_v29, 8.507059e+37  ;;  %v995_v16 = vor.u32 1.1754944e-38, %v994_v24 }
 0x33d   : > { %v1750_v48 = vpop.eup %1749  ;;  %v944_v49 = vmul.f32 %v1748_v37, %v943_v43  ;;  %1619 = vmatmul.msk.f32.vlgmr.msra.gmra.mxu2 %vm854_vm3, %v1039_v44 }
 0x33e   : > { %v956_v51 = vmul.f32 %v1750_v48, %v911_v34  ;;  %v2360_v53 = vpop.xlane.xlu1 %919  ;;  %v2362_v54 = vpop.xlane.xlu0 %913  ;;  %vm961_vm12 = vweird.f32 %v1750_v48 }
 0x33f   : > { %v945_v55 = vadd.f32 %v1748_v37, %v944_v49  ;;  %1753 = vrcp.f32 %v2360_v53  ;;  %vm2373_vm15 = vmor %vm960_vm13, %vm961_vm12  ;;  %v1006_v8 = vand.u32 2147483647, %v2360_v53  ;;  %v1008_v9 = vand.u32 2147483648, %v2360_v53 }
 0x340   : > { %v1752_v57 = vpop.eup %1751  ;;  %v957_v47 = vsub.f32 1.0, %v956_v51  ;;  %1755 = vrcp.f32 %v2362_v54  ;;  %v978_v22 = vand.u32 2147483647, %v2362_v54  ;;  %v980_v28 = vand.u32 2147483648, %v2362_v54 }
 0x341   : > { %v949_v17 = vsel %vm948_vm10, %v1748_v37, %v945_v55  ;;  %v984_v59 = vmul.f32 %v1752_v57, %v917_v42  ;;  %v2366_v27 = vpop.xlane.xlu2 %925  ;;  %vm989_vm4 = vweird.f32 %v1752_v57  ;;  %vm1002_vm10 = vweird.f32 %v2360_v53 }
 0x342   : > { %v954_v12 = vsel %vm951_vm11, %v953_v58, %v949_v17  ;;  %v958_v31 = vmul.f32 %v1750_v48, %v957_v47  ;;  %1757 = vrcp.f32 %v2366_v27  ;;  %vm990_vm7 = vmor %vm988_vm5, %vm989_vm4  ;;  %vm1007_vm12 = vcmp.eq.f32.partialorder %v1006_v8, 8.507059e+37 }
 0x343   : > { %v985_v61 = vsub.f32 1.0, %v984_v59  ;;  %v1040_v5 = vmul.f32 %v2249_v23, %v954_v12  ;;  %v1009_v42 = vor.u32 1.1754944e-38, %v1008_v9  ;;  %vm974_vm13 = vweird.f32 %v2362_v54 }
 0x344   : > { %v959_v62 = vadd.f32 %v1750_v48, %v958_v31  ;;  %v1036_v55 = vand.u32 2147483648, %v2366_v27  ;;  %vm1030_vm5 = vweird.f32 %v2366_v27 }
 0x345   : > { %v1754_v1 = vpop.eup %1753  ;;  %v986_v4 = vmul.f32 %v1752_v57, %v985_v61  ;;  %1620 = vmatmul.msk.f32.vlgmr.msra.gmra.mxu3 %vm854_vm3, %v1040_v5 }
 0x346   : > { %v1756_v6 = vpop.eup %1755  ;;  %v963_v10 = vsel %vm2373_vm15, %v1750_v48, %v959_v62  ;;  %v998_v7 = vmul.f32 %v1754_v1, %v2360_v53  ;;  %v2385_v14 = vpop.xlane.xlu0 %922  ;;  %vm1003_vm8 = vweird.f32 %v1754_v1  ;;  %vm979_vm15 = vcmp.eq.f32.partialorder %v978_v22, 8.507059e+37 }
 0x347   : > { %v987_v21 = vadd.f32 %v1752_v57, %v986_v4  ;;  %v970_v26 = vmul.f32 %v1756_v6, %v2362_v54  ;;  %v968_v23 = vsel %vm2369_vm14, %v967_v3, %v963_v10  ;;  %1759 = vrcp.f32 %v2385_v14  ;;  %vm1004_vm11 = vmor %vm1002_vm10, %vm1003_vm8 }
 0x348   : > { %v999_v30 = vsub.f32 1.0, %v998_v7  ;;  %v1758_v13 = vpop.eup %1757  ;;  %vm975_vm9 = vweird.f32 %v1756_v6  ;;  %v1041_v37 = vmul.f32 %v2253_v36, %v968_v23  ;;  %v981_v48 = vor.u32 1.1754944e-38, %v980_v28 }
 0x349   : > { %v991_v15 = vsel %vm990_vm7, %v1752_v57, %v987_v21  ;;  %v971_v20 = vsub.f32 1.0, %v970_v26  ;;  %v1026_v34 = vmul.f32 %v1758_v13, %v2366_v27  ;;  %vm976_vm14 = vmor %vm974_vm13, %vm975_vm9  ;;  %vm1031_vm4 = vweird.f32 %v1758_v13 }
 0x34a   : > { %v996_v32 = vsel %vm2380_vm6, %v995_v16, %v991_v15  ;;  %v1000_v33 = vmul.f32 %v1754_v1, %v999_v30  ;;  %1621 = vmatmul.msk.f32.vlgmr.msra.gmra.mxu0 %vm854_vm3, %v1041_v37  ;;  %v1034_v57 = vand.u32 2147483647, %v2366_v27  ;;  %vm1032_vm6 = vmor %vm1030_vm5, %vm1031_vm4  ;;  %v1022_v25 = vand.u32 2147483648, %v2385_v14 }
 0x34b   : > { %v972_v35 = vmul.f32 %v1756_v6, %v971_v20  ;;  %v1027_v39 = vsub.f32 1.0, %v1026_v34  ;;  %v1043_v40 = vmul.f32 %v2258_v45, %v996_v32  ;;  %v1020_v59 = vand.u32 2147483647, %v2385_v14 }
 0x34c   : > { %v1001_v38 = vadd.f32 %v1754_v1, %v1000_v33  ;;  %vm1035_vm8 = vcmp.eq.f32.partialorder %v1034_v57, 8.507059e+37  ;;  %vm1016_vm9 = vweird.f32 %v2385_v14  ;;  %vm1487_vm13 = vcmask 130048  }
 0x34d   : > { %v973_v43 = vadd.f32 %v1756_v6, %v972_v35  ;;  %v1760_v44 = vpop.eup %1759  ;;  %v1028_v36 = vmul.f32 %v1758_v13, %v1027_v39  ;;  %1623 = vmatmul.msk.f32.vlgmr.msrb.gmra.mxu2 %vm854_vm3, %v1043_v40 }
 0x34e   : > { %v1005_v46 = vsel %vm1004_vm11, %v1754_v1, %v1001_v38  ;;  %v1012_v45 = vmul.f32 %v1760_v44, %v2385_v14  ;;  %vm1017_vm7 = vweird.f32 %v1760_v44  ;;  %vm1021_vm11 = vcmp.eq.f32.partialorder %v1020_v59, 8.507059e+37 }
 0x34f   : > { %v1010_v49 = vsel %vm1007_vm12, %v1009_v42, %v1005_v46  ;;  %v977_v50 = vsel %vm976_vm14, %v1756_v6, %v973_v43  ;;  %v1029_v53 = vadd.f32 %v1758_v13, %v1028_v36  ;;  %vm1018_vm10 = vmor %vm1016_vm9, %vm1017_vm7  ;;  %vm1485_vm12 = vcmask 97280  }
 0x350   : > { %v982_v51 = vsel %vm979_vm15, %v981_v48, %v977_v50  ;;  %v1044_v54 = vmul.f32 %v2262_v52, %v1010_v49  ;;  %v1013_v58 = vsub.f32 1.0, %v1012_v45  ;;  %v1037_v52 = vor.u32 1.1754944e-38, %v1036_v55 }
 0x351   : > { %v1042_v47 = vmul.f32 %v2264_v56, %v982_v51  ;;  %v1033_v17 = vsel %vm1032_vm6, %v1758_v13, %v1029_v53  ;;  %v1023_v56 = vor.u32 1.1754944e-38, %v1022_v25  ;;  %vm1489_vm14 = vcmask 162816  }
 0x352   : > { %1624 = vmatmul.msk.f32.vlgmr.msrb.gmra.mxu3 %vm854_vm3, %v1044_v54  ;;  %v1014_v19 = vmul.f32 %v1760_v44, %v1013_v58  ;;  %v1038_v27 = vsel %vm1035_vm8, %v1037_v52, %v1033_v17 }
 0x353   : > { %1622 = vmatmul.msk.f32.vlgmr.msrb.gmra.mxu1 %vm854_vm3, %v1042_v47  ;;  %v1046_v24 = vmul.f32 %v2274_v60, %v1038_v27 }
 0x354   : > { %v1015_v12 = vadd.f32 %v1760_v44, %v1014_v19 }
 0x356   : > { %v1019_v31 = vsel %vm1018_vm10, %v1760_v44, %v1015_v12 }
 0x357   : > { %v1024_v29 = vsel %vm1021_vm11, %v1023_v56, %v1019_v31 }
 0x358   : > { %v1045_v61 = vmul.f32 %v2282_v63, %v1024_v29 }
 0x35a   : > { %1625 = vmatmul.msk.f32.vlgmr.msrb.gmra.mxu0 %vm854_vm3, %v1045_v61 }
 0x35b   : > { %1626 = vmatmul.msk.f32.vlgmr.msra.gmra.mxu1 %vm854_vm3, %v1046_v24 }
 0x3c0   : > { %v1179_v0 = vpop.f32.mrf.mxu2 }
 0x3c1   : > { %v1345_v35 = vrot.slane %v1179_v0, 4 }
 0x3c7   : > { %v1225_v62 = vpop.f32.mrf.mxu0 }
 0x3c8   : > { %v1343_v1 = vrot.slane %v1225_v62, 4  ;;  %v1202_v2 = vpop.f32.mrf.mxu3  ;;  %v1346_v43 = vsel %vm261_vm1, %v1225_v62, %v1345_v35 }
 0x3c9   : > { %v1357_v6 = vrot.slane %v1202_v2, 4  ;;  %v1354_v51 = vperm.slane %v1346_v43, %v2070_v18 }
 0x3ca   : > { %v1344_v4 = vsel %vm261_vm1, %v1343_v1, %v1179_v0 }
 0x3cb   : > { %v1350_v11 = vperm.slane %v1344_v4, %v2070_v18  ;;  %v1405_v27 = vrot.slane %v1354_v51, 4 }
 0x3cd   : > { %v1393_v26 = vrot.slane %v1350_v11, 4 }
 0x3d0   : > { %v1248_v3 = vpop.f32.mrf.mxu1  ;;  %v1271_v60 = vpop.f32.mrf.mxu2 }
 0x3d1   : > { %v1355_v5 = vrot.slane %v1248_v3, 4  ;;  %v1358_v7 = vsel %vm261_vm1, %v1248_v3, %v1357_v6  ;;  %v1369_v8 = vrot.slane %v1271_v60, 4 }
 0x3d2   : > { %v1366_v23 = vperm.slane %v1358_v7, %v2070_v18 }
 0x3d3   : > { %v1356_v10 = vsel %vm261_vm1, %v1355_v5, %v1202_v2 }
 0x3d4   : > { %v1362_v63 = vperm.slane %v1356_v10, %v2070_v18  ;;  %v1403_v48 = vrot.slane %v1366_v23, 4  ;;  %v1406_v24 = vsel %vm261_vm1, %v1366_v23, %v1405_v27 }
 0x3d5   : > { %v1294_v14 = vpop.f32.mrf.mxu3  ;;  %v1414_v0 = vperm.slane %v1406_v24, %v2098_v41 }
 0x3d6   : > { %v1391_v21 = vrot.slane %v1362_v63, 4  ;;  %v1381_v16 = vrot.slane %v1294_v14, 4  ;;  %v1394_v33 = vsel %vm261_vm1, %v1362_v63, %v1393_v26  ;;  %v1404_v17 = vsel %vm261_vm1, %v1403_v48, %v1354_v51 }
 0x3d7   : > { %v1317_v30 = vpop.f32.mrf.mxu0  ;;  %v1402_v44 = vperm.slane %v1394_v33, %v2098_v41  ;;  %v1410_v31 = vperm.slane %v1404_v17, %v2098_v41  ;;  %v1453_v6 = vrot.slane %v1414_v0, 4 }
 0x3d8   : > { %v1340_v9 = vpop.f32.mrf.mxu1  ;;  %v1367_v13 = vrot.slane %v1317_v30, 4  ;;  %v1370_v15 = vsel %vm261_vm1, %v1317_v30, %v1369_v8  ;;  %v1392_v34 = vsel %vm261_vm1, %v1391_v21, %v1350_v11 }
 0x3d9   : > { %v1379_v20 = vrot.slane %v1340_v9, 4  ;;  %v1382_v22 = vsel %vm261_vm1, %v1340_v9, %v1381_v16  ;;  %v1378_v28 = vperm.slane %v1370_v15, %v2070_v18  ;;  %v1398_v46 = vperm.slane %v1392_v34, %v2098_v41 }
 0x3da   : > { %v1390_v32 = vperm.slane %v1382_v22, %v2070_v18  ;;  %v1368_v37 = vsel %vm261_vm1, %v1367_v13, %v1271_v60  ;;  %v1445_v57 = vrot.slane %v1402_v44, 4  ;;  %v1449_v1 = vrot.slane %v1410_v31, 4 }
 0x3db   : > { %v1380_v38 = vsel %vm261_vm1, %v1379_v20, %v1294_v14  ;;  %v1374_v39 = vperm.slane %v1368_v37, %v2070_v18  ;;  %v1429_v40 = vrot.slane %v1378_v28, 4  ;;  %v1441_v47 = vrot.slane %v1398_v46, 4 }
 0x3dc   : > { %v1386_v42 = vperm.slane %v1380_v38, %v2070_v18  ;;  %v1427_v50 = vrot.slane %v1390_v32, 4 }
 0x3dd   : > { %v1417_v36 = vrot.slane %v1374_v39, 4  ;;  %v1430_v45 = vsel %vm261_vm1, %v1390_v32, %v1429_v40 }
 0x3de   : > { %v1415_v49 = vrot.slane %v1386_v42, 4  ;;  %v1438_v25 = vperm.slane %v1430_v45, %v2098_v41  ;;  %v1428_v19 = vsel %vm261_vm1, %v1427_v50, %v1378_v28 }
 0x3df   : > { %v1418_v53 = vsel %vm261_vm1, %v1386_v42, %v1417_v36  ;;  %v1434_v29 = vperm.slane %v1428_v19, %v2098_v41 }
 0x3e0   : > { %v1416_v55 = vsel %vm261_vm1, %v1415_v49, %v1374_v39  ;;  %v1426_v54 = vperm.slane %v1418_v53, %v2098_v41  ;;  %v1451_v62 = vrot.slane %v1438_v25, 4  ;;  %v1454_v10 = vsel %vm261_vm1, %v1438_v25, %v1453_v6 }
 0x3e1   : > { %v1422_v58 = vperm.slane %v1416_v55, %v2098_v41  ;;  %v1447_v2 = vrot.slane %v1434_v29, 4  ;;  %v1450_v4 = vsel %vm261_vm1, %v1434_v29, %v1449_v1 }
 0x3e2   : > { %v1446_v59 = vsel %vm261_vm1, %v1426_v54, %v1445_v57  ;;  %v1443_v12 = vrot.slane %v1426_v54, 4  ;;  %v1452_v3 = vsel %vm261_vm1, %v1451_v62, %v1414_v0 }
 0x3e3   : > { %v1442_v18 = vsel %vm261_vm1, %v1422_v58, %v1441_v47  ;;  %v1439_v52 = vrot.slane %v1422_v58, 4  ;;  %1464 = vrot.lane.b32.xlu2 %v1446_v59, %s1907_s28  ;;  %v1448_v5 = vsel %vm261_vm1, %v1447_v2, %v1410_v31 }
 0x3e4   : > { %1456 = vrot.lane.b32.xlu1 %v1442_v18, %s1908_s7  ;;  %v1444_v56 = vsel %vm261_vm1, %v1443_v12, %v1402_v44  ;;  %s1841_s7 = scalar_lea.hbm %s2501_s3, 16 }
 0x3e5   : > { %v1440_v61 = vsel %vm261_vm1, %v1439_v52, %v1398_v46  ;;  %1460 = vrot.lane.b32.xlu0 %v1444_v56, %s1909_s8  ;;  %vm1491_vm1 = vcmask 195584   ;;  %p1843_p8 = scmp.lt.s32.totalorder %s1841_s7, %s1837_s27 }
 0x3e7   : > { %p1844_p7 = por %p1843_p8, %p1842_p12 }
 0x3e9   : > { %p1845_p9 = pnand %p1844_p7, %p1840_p5 }
 0x3eb   : > { %1476 = vrot.lane.b32.xlu2 %v1452_v3, %s1910_s10 }
 0x3ec   : > { %1472 = vrot.lane.b32.xlu1 %v1450_v4, %s1911_s11 }
 0x3ed   : > { %1468 = vrot.lane.b32.xlu0 %v1448_v5, %s1912_s20 }
 0x3f5   : > { %1480 = vrot.lane.b32.xlu0 %v1454_v10, %s1913_s30 }
 0x43d   : > { %v1465_v60 = vpop.permute.xlu2 %1464 }
 0x445   : > { %v1477_v23 = vpop.permute.xlu2 %1476 }
 0x456   : > { %v1457_v41 = vpop.permute.xlu1 %1456 }
 0x457   : > { %v1461_v11 = vpop.permute.xlu0 %1460  ;;  %v1483_v63 = vsel %vm645_vm2, %v1440_v61, %v1457_v41  ;;  %vm1493_vm2 = vcmask 228352  }
 0x458   : > { %v1484_v7 = vsel %vm854_vm3, %v1483_v63, %v1461_v11 }
 0x459   : > { %v1486_v21 = vsel %vm1485_vm12, %v1484_v7, %v1465_v60 }
 0x45e   : > { %v1473_v8 = vpop.permute.xlu1 %1472 }
 0x45f   : > { %v1469_v14 = vpop.permute.xlu0 %1468 }
 0x460   : > { %v1488_v16 = vsel %vm1487_vm13, %v1486_v21, %v1469_v14 }
 0x461   : > { %v1490_v26 = vsel %vm1489_vm14, %v1488_v16, %v1473_v8 }
 0x462   : > { %v1492_v9 = vsel %vm1491_vm1, %v1490_v26, %v1477_v23 }
 0x467   : > { %v1481_v30 = vpop.permute.xlu0 %1480 }
 0x468   : > { %v1494_v13 = vsel %vm1493_vm2, %v1492_v9, %v1481_v30 }
 0x469   : > { %1495 = vst.msk [vmem:[%s204_s22] sm:$0xff] %vm214_vm0, %v1494_v13 }
 0x46a   : > { %1848 = shalt.err (!%p1845_p9)
}
 0x46b   : > { %1637 = dma.vmem_to_hbm [thread:$0]  (%p1994_p13), %s1510_s23, 128, %s1512_s24, %s1497_s19  }
 0x46c PF: > { %s1523_s5 = sand.u32 1, %s1879_s12   ;;  %p2513_p10 = scmp.ge.s32.totalorder %s1891_s15, 2 }
 0x46d   : > { %s1524_s11 = scalar_lea.sflag [#allocation4], %s1523_s5 }
 0x46e   : > { %p1648_p11 = pnand %p2513_p10, %p1999_p4 }
 0x470   : > { %p1649_p0 = pneg %p1648_p11 }
 0x472   : > { %1874 = dma.done.wait (%p1649_p0), %s1524_s11, 128  }
 0x473   : > { %1876 = vsyncadd (%p1649_p0), %s1524_s11, 4294967168  ;;  %p17_p2 = scmp.ge.s32.totalorder %s1974_s26, 4   ;;  %s2514_s12 = smov %s1883_s13 }
 0x474   : > { %s2515_s13 = smov %s1887_s14  ;;  %s2516_s14 = smov %s1986_s29 }
 0x475   : > { %s2517_s15 = smov %s1974_s26  ;;  %19 = sbr.rel (!%p17_p2) target bundleno = 6 (0x6), region = 81 }
 0x47a   :  { %1530 = vsyncpa [#allocation3], 1 }
 0x47b   :  { %1532 = vsyncpa [#allocation3 + $0x1], 1 }
 0x47c   :  { %1533 = vsyncpa [#allocation6], 1 }
 0x47d   :  { %1534 = vsyncpa [#allocation4], 1 }
 0x47e   :  { %1536 = vsyncpa [#allocation4 + $0x1], 1 }

</bundles_post_ra>
